<compile_context>
chip_gen: v7x
topology: tpu7x:2x2x1
jax: 0.10.0
libtpu: 0.0.40
codegen_flags: <defaults>
</compile_context>

<pallas_src>
import functools

import jax
import jax.numpy as jnp
from jax.experimental import pallas as pl
from jax.experimental.pallas import tpu as pltpu


def _round_up(x, m):
    return (x + m - 1) // m * m


def _patch_embed_kernel(a_ref, w_ref, b_ref, o_ref):
    """Grid = (M tiles,).  out = A @ W + bias, weight resident in VMEM.

    a_ref: (tm, Kp)  compute dtype (bf16)
    w_ref: (Kp, Ep)  compute dtype (bf16), same block for every grid step
    b_ref: (1, Ep)   f32, same block for every grid step
    o_ref: (tm, Ep)  output dtype; written once per tile (no accumulator RMW)
    """
    acc = jnp.dot(a_ref[...], w_ref[...], preferred_element_type=jnp.float32)
    o_ref[...] = (acc + b_ref[...]).astype(o_ref.dtype)


def _matmul_bias(a, w, bias2d, *, tm, out_dtype):
    """a: (M, Kp), w: (Kp, Ep) in compute dtype; bias2d: (1, Ep) f32.

    Returns (M, Ep) out_dtype = a @ w + bias.
    """
    M, Kp = a.shape
    _, Ep = w.shape
    grid = (pl.cdiv(M, tm),)

    # VMEM budget: A + output double-buffered, W (+bias) resident.
    cbytes = jnp.dtype(a.dtype).itemsize
    obytes = jnp.dtype(out_dtype).itemsize
    vmem_est = (2 * tm * Kp * cbytes          # A blocks (double-buffered)
                + 2 * Kp * Ep * cbytes        # W (be conservative: x2)
                + 2 * tm * Ep * obytes        # output blocks
                + 2 * Ep * 4)                 # bias
    vmem_limit = int(min(max(vmem_est + (4 << 20), 24 << 20), 48 << 20))

    return pl.pallas_call(
        _patch_embed_kernel,
        out_shape=jax.ShapeDtypeStruct((M, Ep), out_dtype),
        grid_spec=pltpu.PrefetchScalarGridSpec(
            num_scalar_prefetch=0,
            grid=grid,
            in_specs=[
                pl.BlockSpec((tm, Kp), lambda m: (m, 0)),   # A tile (streamed)
                pl.BlockSpec((Kp, Ep), lambda m: (0, 0)),   # W (resident, fetched once)
                pl.BlockSpec((1, Ep), lambda m: (0, 0)),    # bias (fetched once)
            ],
            out_specs=pl.BlockSpec((tm, Ep), lambda m: (m, 0)),
        ),
        compiler_params=pltpu.CompilerParams(
            dimension_semantics=("parallel",),
            vmem_limit_bytes=vmem_limit,
        ),
    )(a, w, bias2d)


@functools.partial(
    jax.jit,
    static_argnames=("patch_size", "t_kernel", "t_stride", "tm", "compute_dtype"),
)
def patch_embedding(x, weight, bias, *, patch_size, t_kernel=2, t_stride=2,
                    tm=512, compute_dtype=jnp.bfloat16):
    """
    x:      (B, T, C, H, W)          -- NTCHW (tensor the module receives)
    weight: (E, C, t_kernel, P, P)   -- Conv3d weight layout
    bias:   (E,)
    returns (B, N, E) with N = (T // t_stride) * (H // P) * (W // P),
    patch index order (t', h', w') exactly as `b e t h w -> b (t h w) e`.
    """
    B, T, C, H, W = x.shape
    E = weight.shape[0]
    P = patch_size
    assert t_kernel == t_stride, "non-overlapping temporal conv assumed"
    tp, hp, wp = T // t_stride, H // P, W // P
    N = tp * hp * wp
    K = C * t_kernel * P * P
    M = B * N

    # ---- glue: patch extraction (pure reshape/transpose), bf16 first ----
    # TODO(synk): this 8-D permutation stays as an XLA transpose; the gather
    # it implies is not expressible as a BlockSpec index_map, so it is not
    # fused into the Pallas DMA.  Casting to bf16 first halves its HBM bytes.
    xc = x.astype(compute_dtype)
    patches = xc.reshape(B, tp, t_kernel, C, hp, P, wp, P)
    patches = patches.transpose(0, 1, 4, 6, 3, 2, 5, 7)   # (c, dt, dh, dw) flatten order
    a = patches.reshape(M, K)

    w_mat = weight.reshape(E, K).T.astype(compute_dtype)  # (K, E), E on lanes

    # ---- K alignment: typically already a multiple of 128 (P in {8,16}) ----
    if K % 128 != 0:
        Kp = _round_up(K, 128)
        a = jnp.pad(a, ((0, 0), (0, Kp - K)))              # rare fallback
        w_mat = jnp.pad(w_mat, ((0, Kp - K), (0, 0)))
    else:
        Kp = K

    # ---- E: lane-dense output columns (pad to 128, sliced back below) ----
    # NOTE: for E < 128 (tiny embed dims) this knowingly pays up to 4x on W /
    # output bytes in exchange for unmasked lane-dense stores; for typical
    # embed_dim >= 128 the pad is a no-op.
    Ep = _round_up(E, 128)
    if Ep != E:
        w_mat = jnp.pad(w_mat, ((0, 0), (0, Ep - E)))
    bias2d = jnp.pad(bias.astype(jnp.float32), (0, Ep - E)).reshape(1, Ep)

    # ---- M tiling: big tiles, but >= 2 tiles so v7x megacore can split ----
    tm_eff = max(8, min(tm, _round_up(pl.cdiv(M, 2), 8)))

    # ---- hot path: Pallas matmul + bias, output written in x.dtype ----
    out = _matmul_bias(a, w_mat, bias2d, tm=tm_eff, out_dtype=x.dtype)
    out = out[:, :E]
    return out.reshape(B, N, E)


if __name__ == "__main__":
    # Small shapes consistent with the module structure.
    B, T, C, H, W = 2, 8, 4, 16, 16      # sequence_length=8, img_size=16
    P, E = 8, 32                         # patch_size=8, embed_dim=32
    KT, KS = 2, 2                        # temporal kernel / stride

    key = jax.random.PRNGKey(0)
    kx, kw, kb = jax.random.split(key, 3)

    x = jax.random.normal(kx, (B, T, C, H, W), dtype=jnp.float32)
    fan_in = C * KT * P * P
    weight = jax.random.normal(kw, (E, C, KT, P, P), dtype=jnp.float32) / jnp.sqrt(fan_in)
    bias = jax.random.normal(kb, (E,), dtype=jnp.float32) * 0.01

    out = patch_embedding(x, weight, bias, patch_size=P, t_kernel=KT, t_stride=KS)
    out = jax.block_until_ready(out)

    # References.
    tp, hp, wp = T // KS, H // P, W // P
    N = tp * hp * wp
    ref_patches = x.reshape(B, tp, KT, C, hp, P, wp, P).transpose(0, 1, 4, 6, 3, 2, 5, 7)
    a_f32 = ref_patches.reshape(B * N, fan_in)
    w_ke = weight.reshape(E, fan_in).T

    # (1) Reference matched to the kernel's bf16 inputs / f32 accumulation.
    a_bf = a_f32.astype(jnp.bfloat16).astype(jnp.float32)
    w_bf = w_ke.astype(jnp.bfloat16).astype(jnp.float32)
    ref_bf = (jnp.dot(a_bf, w_bf, precision=jax.lax.Precision.HIGHEST) + bias).reshape(B, N, E)
    # (2) Full f32 reference (loose tolerance: kernel uses bf16 inputs).
    ref_f32 = (jnp.dot(a_f32, w_ke, precision=jax.lax.Precision.HIGHEST) + bias).reshape(B, N, E)

    assert out.shape == (B, N, E)
    assert jnp.allclose(out, ref_bf, atol=2e-3, rtol=2e-3), (
        float(jnp.max(jnp.abs(out - ref_bf))))
    assert jnp.allclose(out, ref_f32, atol=5e-2, rtol=5e-2), (
        float(jnp.max(jnp.abs(out - ref_f32))))

    print("KERNEL_OK")
</pallas_src>

<mosaic_0001>
module attributes {stable_mosaic.version = 11 : i64} {
  func.func @_patch_embed_kernel(%arg0: i32, %arg1: memref<16x512xbf16, #tpu.memory_space<vmem>>, %arg2: memref<512x128xbf16, #tpu.memory_space<vmem>>, %arg3: memref<1x128xf32, #tpu.memory_space<vmem>>, %arg4: memref<16x128xf32, #tpu.memory_space<vmem>>) attributes {dimension_semantics = [#tpu.dimension_semantics<parallel>], iteration_bounds = array<i64: 2>, scalar_prefetch = 0 : i64, scratch_operands = 0 : i64, tpu.core_type = #tpu.core_type<tc>, window_params = [{transform_indices = @transform_0, window_bounds = array<i64: 16, 512>}, {pipeline_mode = #tpu.pipeline_mode<synchronous>, transform_indices = @transform_1, window_bounds = array<i64: 512, 128>}, {pipeline_mode = #tpu.pipeline_mode<synchronous>, transform_indices = @transform_2, window_bounds = array<i64: 1, 128>}, {transform_indices = @transform_3, window_bounds = array<i64: 16, 128>}]} {
    %c0 = arith.constant 0 : index
    %c0_0 = arith.constant 0 : index
    %0 = vector.load %arg1[%c0, %c0_0] : memref<16x512xbf16, #tpu.memory_space<vmem>>, vector<16x512xbf16>
    %c0_1 = arith.constant 0 : index
    %c0_2 = arith.constant 0 : index
    %1 = vector.load %arg2[%c0_1, %c0_2] : memref<512x128xbf16, #tpu.memory_space<vmem>>, vector<512x128xbf16>
    %cst = arith.constant dense<0.000000e+00> : vector<16x128xf32>
    %2 = tpu.matmul %0, %1, %cst {dimension_numbers = #tpu.dot_dimension_numbers<[1], [0], [0], [1], [0, 0, 1, 1], [], []>} : vector<16x512xbf16>, vector<512x128xbf16>, vector<16x128xf32> -> vector<16x128xf32>
    %c0_3 = arith.constant 0 : index
    %c0_4 = arith.constant 0 : index
    %3 = vector.load %arg3[%c0_3, %c0_4] : memref<1x128xf32, #tpu.memory_space<vmem>>, vector<1x128xf32>
    %4 = vector.broadcast %3 : vector<1x128xf32> to vector<16x128xf32>
    %5 = arith.addf %2, %4 : vector<16x128xf32>
    %c0_5 = arith.constant 0 : index
    %c0_6 = arith.constant 0 : index
    %6 = vector.load %arg4[%c0_5, %c0_6] : memref<16x128xf32, #tpu.memory_space<vmem>>, vector<16x128xf32>
    tpu.vector_store %arg4[%c0_5, %c0_6], %5 {strides = array<i32>} : memref<16x128xf32, #tpu.memory_space<vmem>>, vector<16x128xf32>,
    return
  }
  func.func @transform_0(%arg0: i32) -> (i32, i32) {
    %c0_i32 = arith.constant 0 : i32
    %c0_i32_0 = arith.constant 0 : i32
    return %arg0, %c0_i32 : i32, i32
  }
  func.func @transform_1(%arg0: i32) -> (i32, i32) {
    %c0_i32 = arith.constant 0 : i32
    %c0_i32_0 = arith.constant 0 : i32
    %c0_i32_1 = arith.constant 0 : i32
    return %c0_i32, %c0_i32_0 : i32, i32
  }
  func.func @transform_2(%arg0: i32) -> (i32, i32) {
    %c0_i32 = arith.constant 0 : i32
    %c0_i32_0 = arith.constant 0 : i32
    %c0_i32_1 = arith.constant 0 : i32
    return %c0_i32, %c0_i32_0 : i32, i32
  }
  func.func @transform_3(%arg0: i32) -> (i32, i32) {
    %c0_i32 = arith.constant 0 : i32
    %c0_i32_0 = arith.constant 0 : i32
    return %arg0, %c0_i32 : i32, i32
  }
}

</mosaic_0001>

<bundles_post_ra>
// kernel: patch_embedding.1
= control target key start
LH: loop header
LB: loop body
LE: loop exit
PB: predicated region body
PF: predicated region fallthrough
CT: control target
= control target key end

     0   :  { %8 = vsyncpa [#allocation3], 0  ;;  %s1086_s0 = inlined_call_operand.vmem [shape: bf16[32,512], index: 0, kind: input, shape index: {}]   ;;  %s1087_s1 = inlined_call_operand.vmem [shape: bf16[512,128], index: 1, kind: input, shape index: {}]   ;;  %s1088_s2 = inlined_call_operand.vmem [shape: f32[1,128], index: 2, kind: input, shape index: {}]   ;;  %s1089_s3 = inlined_call_operand.hbm [shape: f32[32,128], index: 3, kind: output, shape index: {}]  }
   0x1   :  { %10 = vsyncpa [#allocation3 + $0x1], 0  ;;  %s885_s12 = smov 0   ;;  %s887_s13 = smov 0  }
   0x2   :  { %s889_s14 = smov 0   ;;  %s891_s15 = smov 0  }
   0x3 LB: > { %s906_s16 = sadd.s32 4294967295, %s860_s15   ;;  %s623_s17 = sadd.s32 4294967294, %s860_s15   ;;  %s860_s15 = sphi %s891_s15, %s1095_s15   ;;  %s856_s14 = sphi %s889_s14, %s1094_s14   ;;  %s852_s13 = sphi %s887_s13, %s1093_s13   ;;  %s848_s12 = sphi %s885_s12, %s1092_s12  }
   0x4   : > { %s910_s18 = sadd.s32 1, %s860_s15   ;;  %s91_s19 = sadd.s32 1, %s856_s14 }
   0x5   : > { %s88_s20 = ssub.s32 %s860_s15, %s910_s18  ;;  %p101_p0 = scmp.ne.s32.totalorder %s856_s14, %s852_s13 }
   0x6   : > { %p89_p1 = scmp.eq.s32.totalorder %s88_s20, 0  ;;  %p102_p2 = scmp.eq.s32.totalorder %s906_s16, 1 }
   0x7   : > { %p107_p3 = scmp.ne.s32.totalorder %s852_s13, %s848_s12  ;;  %p108_p4 = scmp.eq.s32.totalorder %s623_s17, 1 }
   0x8   : > { %s921_s21 = scalar_select %p89_p1, %s856_s14, %s91_s19  }
   0x9   : > { %p923_p5 = por %p102_p2, %p101_p0  ;;  %p927_p6 = por %p108_p4, %p107_p3 }
   0xa   : > { %p626_p7 = scmp.ge.s32.totalorder %s860_s15, 1  ;;  %p142_p8 = scmp.lt.s32.totalorder %s860_s15, 3 }
   0xc   : > { %p143_p9 = pnand %p626_p7, %p142_p8 }
   0xd   : > { %v760_v0 = vld [vmem:[%s1087_s1 + $0x40] sm:$0xff] (!%p143_p9)   ;;  %v764_v4 = vld [vmem:[%s1087_s1 + $0x48] sm:$0xff] (!%p143_p9)   ;;  %v768_v8 = vld [vmem:[%s1087_s1 + $0x50] sm:$0xff] (!%p143_p9)   ;;  %s628_s11 = sshll.u32 (!%p143_p9), %s906_s16, 1  ;;  %s164_s19 = sand.u32 (!%p143_p9), 1, %s852_s13  }
   0xe   : > { %146 = sbr.rel (%p143_p9) target bundleno = 283 (0x11b), region = 32  ;;  %v761_v1 = vld [vmem:[%s1087_s1 + $0xc0] sm:$0xff] (!%p143_p9)   ;;  %675 = vmatprep.subr.bf16.mxu0 (!%p143_p9), %v760_v0  ;;  %v765_v5 = vld [vmem:[%s1087_s1 + $0xc8] sm:$0xff] (!%p143_p9)   ;;  %v769_v9 = vld [vmem:[%s1087_s1 + $0xd0] sm:$0xff] (!%p143_p9)   ;;  %p168_p10 = scmp.lt.s32.totalorder (!%p143_p9), %s628_s11, 3 }
   0xf   : > { %v762_v2 = vld [vmem:[%s1087_s1] sm:$0xff] (!%p143_p9)   ;;  %697 = vmatprep.subr.bf16.mxu1 (!%p143_p9), %v761_v1  ;;  %v766_v6 = vld [vmem:[%s1087_s1 + $0x8] sm:$0xff] (!%p143_p9)   ;;  %v770_v10 = vld [vmem:[%s1087_s1 + $0x10] sm:$0xff] (!%p143_p9)   ;;  %s627_s20 = sshll.u32 (!%p143_p9), %s164_s19, 4  ;;  %s674_s28 = sshll.u32 (!%p143_p9), %s906_s16, 8 }
  0x10   : > { %v763_v3 = vld [vmem:[%s1087_s1 + $0x80] sm:$0xff] (!%p143_p9)   ;;  %676 = vmatpush3.bf16.msra.mxu0 (!%p143_p9), %v762_v2  ;;  %v767_v7 = vld [vmem:[%s1087_s1 + $0x88] sm:$0xff] (!%p143_p9)   ;;  %v771_v11 = vld [vmem:[%s1087_s1 + $0x90] sm:$0xff] (!%p143_p9)   ;;  %s1043_s4 = scalar_lea.hbm (!%p143_p9), %s1089_s3, %s674_s28  ;;  %s1045_s5 = scalar_lea.sflag (!%p143_p9), [#allocation3], %s164_s19 }
  0x11   : > { %698 = vmatpush3.bf16.msra.mxu1 (!%p143_p9), %v763_v3  ;;  %677 = vmatprep.subr.bf16.mxu0 (!%p143_p9), %v764_v4  ;;  %v772_v12 = vld [vmem:[%s1087_s1 + $0x58] sm:$0xff] (!%p143_p9)   ;;  %v776_v16 = vld [vmem:[%s1087_s1 + $0x60] sm:$0xff] (!%p143_p9)   ;;  %v780_v20 = vld [vmem:[%s1087_s1 + $0x68] sm:$0xff] (!%p143_p9)   ;;  %s862_s16 = smov (!%p143_p9), [#allocation2]  }
  0x12   : > { %699 = vmatprep.subr.bf16.mxu1 (!%p143_p9), %v765_v5  ;;  %v773_v13 = vld [vmem:[%s1087_s1 + $0xd8] sm:$0xff] (!%p143_p9)   ;;  %v777_v17 = vld [vmem:[%s1087_s1 + $0xe0] sm:$0xff] (!%p143_p9)   ;;  %v781_v21 = vld [vmem:[%s1087_s1 + $0xe8] sm:$0xff] (!%p143_p9)   ;;  %s802_s7 = sshll.u32 (!%p143_p9), %s862_s16, 4  ;;  %s803_s7 = int_to_ptr.vmem [resolvable:$false] %s802_s7 }
  0x13   : > { %v774_v14 = vld [vmem:[%s1087_s1 + $0x18] sm:$0xff] (!%p143_p9)   ;;  %v778_v18 = vld [vmem:[%s1087_s1 + $0x20] sm:$0xff] (!%p143_p9)   ;;  %v782_v22 = vld [vmem:[%s1087_s1 + $0x28] sm:$0xff] (!%p143_p9)  }
  0x14   : > { %678 = vmatpush3.bf16.msra.mxu0 (!%p143_p9), %v766_v6  ;;  %v775_v15 = vld [vmem:[%s1087_s1 + $0x98] sm:$0xff] (!%p143_p9)   ;;  %v779_v19 = vld [vmem:[%s1087_s1 + $0xa0] sm:$0xff] (!%p143_p9)   ;;  %v783_v23 = vld [vmem:[%s1087_s1 + $0xa8] sm:$0xff] (!%p143_p9)  }
  0x15   : > { %700 = vmatpush3.bf16.msra.mxu1 %v767_v7  ;;  %679 = vmatprep.subr.bf16.mxu0 %v768_v8  ;;  %s1097_s11 = smov (!%p168_p10, %s628_s11), 3  ;;  %v784_v24 = vld [vmem:[%s1087_s1 + $0x70] sm:$0xff]   ;;  %v788_v28 = vld [vmem:[%s1087_s1 + $0x78] sm:$0xff]   ;;  %v631_v38 = vld [vmem:[%s1088_s2] ss:$0 sm:$0xff] }
  0x16   : > { %701 = vmatprep.subr.bf16.mxu1 %v769_v9  ;;  %v785_v25 = vld [vmem:[%s1087_s1 + $0xf0] sm:$0xff]   ;;  %s673_s26 = sshll.u32 %s1097_s11, 4  ;;  %v789_v29 = vld [vmem:[%s1087_s1 + $0xf8] sm:$0xff]  }
  0x17   : > { %v786_v26 = vld [vmem:[%s1087_s1 + $0x30] sm:$0xff]   ;;  %s172_s11 = scalar_lea.vmem %s1086_s0, %s673_s26  ;;  %v790_v30 = vld [vmem:[%s1087_s1 + $0x38] sm:$0xff]   ;;  %s166_s26 = scalar_lea.vmem [#allocation2], %s627_s20 }
  0x18   : > { %680 = vmatpush3.bf16.msra.mxu0 %v770_v10  ;;  %v787_v27 = vld [vmem:[%s1087_s1 + $0xb0] sm:$0xff]   ;;  %v791_v31 = vld [vmem:[%s1087_s1 + $0xb8] sm:$0xff]   ;;  %s561_s27 = sshll.u32 %s166_s26, 4  ;;  %s1038_s27 = int_to_ptr.vmem [resolvable:$true] %s561_s27 }
  0x19   : > { %702 = vmatpush3.bf16.msra.mxu1 %v771_v11  ;;  %681 = vmatprep.subr.bf16.mxu0 %v772_v12  ;;  %v792_v32 = vld [vmem:[%s172_s11] ss:$16 sps:$4 sm:$0xff]   ;;  %v794_v33 = vld [vmem:[%s172_s11 + $0x4] ss:$16 sps:$4 sm:$0xff]   ;;  %v795_v34 = vld [vmem:[%s172_s11 + $0x8] ss:$16 sps:$4 sm:$0xff]   ;;  %p805_p0 = scmp.lt.s32.totalorder %s1038_s27, %s803_s7 }
  0x1a   : > { %703 = vmatprep.subr.bf16.mxu1 %v773_v13  ;;  %v797_v35 = vld [vmem:[%s172_s11 + $0xc] ss:$16 sps:$4 sm:$0xff]   ;;  %495 = vmatprep.mubr.bf16.mxu0 %v794_v33  ;;  %s798_s6 = scalar_lea.vmem %s1038_s27, 256  ;;  %s804_s11 = scalar_lea.vmem %s803_s7, 512 }
  0x1b   : > { %536 = vmatprep.mubr.bf16.mxu1 %v797_v35  ;;  %p799_p11 = scmp.ne.s32.totalorder %s1038_s27, %s798_s6  ;;  %p806_p1 = scmp.lt.s32.totalorder %s804_s11, %s798_s6 }
  0x1c   : > { %682 = vmatpush3.bf16.msra.mxu0 %v774_v14 }
  0x1d   : > { %704 = vmatpush3.bf16.msra.mxu1 %v775_v15  ;;  %683 = vmatprep.subr.bf16.mxu0 %v776_v16  ;;  %p800_p12 = pnand %p799_p11, %p923_p5  ;;  %p807_p2 = por %p806_p1, %p805_p0 }
  0x1e   : > { %705 = vmatprep.subr.bf16.mxu1 %v777_v17 }
  0x1f   : > { %p801_p13 = pneg %p800_p12 }
  0x20   : > { %684 = vmatpush3.bf16.msra.mxu0 %v778_v18 }
  0x21   : > { %706 = vmatpush3.bf16.msra.mxu1 %v779_v19  ;;  %685 = vmatprep.subr.bf16.mxu0 %v780_v20  ;;  %p808_p3 = pnand %p807_p2, %p801_p13 }
  0x22   : > { %707 = vmatprep.subr.bf16.mxu1 %v781_v21 }
  0x24   : > { %686 = vmatpush3.bf16.msra.mxu0 %v782_v22 }
  0x25   : > { %708 = vmatpush3.bf16.msra.mxu1 %v783_v23  ;;  %687 = vmatprep.subr.bf16.mxu0 %v784_v24 }
  0x26   : > { %709 = vmatprep.subr.bf16.mxu1 %v785_v25 }
  0x28   : > { %688 = vmatpush3.bf16.msra.mxu0 %v786_v26 }
  0x29   : > { %710 = vmatpush3.bf16.msra.mxu1 %v787_v27  ;;  %689 = vmatprep.subr.bf16.mxu0 %v788_v28 }
  0x2a   : > { %711 = vmatprep.subr.bf16.mxu1 %v789_v29 }
  0x2c   : > { %690 = vmatpush3.bf16.msra.mxu0 %v790_v30 }
  0x2d   : > { %712 = vmatpush3.bf16.msra.mxu1 %v791_v31 }
  0x2f   : > { %496 = vmatmul.mubr.bf16.vlgmr.msra.gmra.mrb[0].mxu0 %v792_v32 }
  0x30   : > { %537 = vmatmul.mubr.bf16.vlgmr.msra.gmra.mrb[0].mxu1 %v795_v34 }
 0x102   : > { %v691_v36 = vpop.f32.mrb[0].mxu0 }
 0x103   : > { %v713_v37 = vpop.f32.mrb[0].mxu1  ;;  %v692_v39 = vpop.f32.mrb[1].mxu0 }
 0x104   : > { %v693_v40 = vadd.f32 %v692_v39, %v691_v36  ;;  %v714_v41 = vpop.f32.mrb[1].mxu1  ;;  %v694_v42 = vpop.f32.mrb[2].mxu0 }
 0x105   : > { %v715_v43 = vadd.f32 %v714_v41, %v713_v37  ;;  %v716_v44 = vpop.f32.mrb[2].mxu1  ;;  %v695_v45 = vpop.f32.mrb[3].mxu0 }
 0x106   : > { %v498_v46 = vadd.f32 %v693_v40, %v631_v38  ;;  %v696_v47 = vadd.f32 %v695_v45, %v694_v42  ;;  %v717_v48 = vpop.f32.mrb[3].mxu1 }
 0x107   : > { %v718_v49 = vadd.f32 %v717_v48, %v716_v44 }
 0x108   : > { %v539_v50 = vadd.f32 %v715_v43, %v498_v46  ;;  %v501_v51 = vadd.f32 %v696_v47, %v631_v38 }
 0x10a   : > { %545 = vst [vmem:[%s166_s26] sm:$0xff] %v539_v50  ;;  %v542_v52 = vadd.f32 %v718_v49, %v501_v51 }
 0x10c   : > { %546 = vst [vmem:[%s166_s26 + $0x8] sm:$0xff] %v542_v52 }
 0x10d   : > { %811 = shalt.err (!%p808_p3)
}
 0x10e   : > { %s812_s8 = scalar_lea.hbm %s1043_s4, 256  ;;  %s816_s17 = scalar_lea.hbm %s1089_s3, 512 }
 0x10f   : > { %p813_p4 = scmp.ne.s32.totalorder %s1043_s4, %s812_s8  ;;  %p817_p9 = scmp.lt.u32.totalorder %s1043_s4, %s1089_s3 }
 0x110   : > { %p818_p10 = scmp.lt.u32.totalorder %s816_s17, %s812_s8  ;;  %p820_p12 = scmp.lt.u32.totalorder %s812_s8, %s1043_s4 }
 0x111   : > { %p814_p7 = pnand %p813_p4, %p923_p5 }
 0x112   : > { %p819_p11 = por %p818_p10, %p817_p9 }
 0x113   : > { %p815_p8 = pneg %p814_p7 }
 0x114   : > { %p821_p13 = por %p820_p12, %p819_p11 }
 0x116   : > { %p822_p0 = pnand %p821_p13, %p815_p8 }
 0x118   : > { %825 = shalt.err (!%p822_p0)
}
 0x119   : > { %s863_s24 = smov 128   ;;  %s864_s25 = smov 8  }
 0x11a   : > { %719 = dma.vmem_to_hbm [thread:$0]  (%p923_p5), %s1038_s27, 256, %s1043_s4, %s1045_s5, %s863_s24, %s863_s24, %s864_s25  }
 0x11b PF: > { %p725_p1 = scmp.ge.s32.totalorder %s860_s15, 2  ;;  %s576_s26 = sand.u32 1, %s848_s12  }
 0x11c   : > { %s577_s28 = scalar_lea.sflag [#allocation3], %s576_s26 }
 0x11d   : > { %p722_p2 = pnand %p725_p1, %p927_p6 }
 0x11f   : > { %843 = dma.done.wait (!%p722_p2), %s577_s28, 256  }
 0x120   : > { %845 = vsyncadd (!%p722_p2), %s577_s28, 4294967040  ;;  %p13_p3 = scmp.ge.s32.totalorder %s910_s18, 4   ;;  %s1092_s12 = smov %s852_s13 }
 0x121   : > { %s1093_s13 = smov %s856_s14  ;;  %s1094_s14 = smov %s921_s21 }
 0x122   : > { %s1095_s15 = smov %s910_s18  ;;  %15 = sbr.rel (!%p13_p3) target bundleno = 3 (0x3), region = 67 }
 0x129   :  { %582 = vsyncpa [#allocation3], 1 }
 0x12a   :  { %584 = vsyncpa [#allocation3 + $0x1], 1 }

</bundles_post_ra>
